<compile_context>
chip_gen: v7x
topology: tpu7x:2x2x1
jax: 0.10.0
libtpu: 0.0.40
codegen_flags: <defaults>
</compile_context>

<pallas_src>
import functools

import jax
import jax.numpy as jnp
from jax.experimental import pallas as pl
from jax.experimental.pallas import tpu as pltpu


def _round_up(v, m):
    return (v + m - 1) // m * m


def _conv_stats_kernel(p_ref, w_ref, y_ref, sum_ref, ssq_ref):
    """Pass 1: conv matmul on the MXU + per-channel sum / sum-of-squares accumulation.

    p_ref:   [block_m, K_pad]   bf16 im2col patches (current M tile)
    w_ref:   [K_pad, OC_pad]    bf16 flattened conv weight (constant block, stays resident)
    y_ref:   [block_m, OC_pad]  f32 conv output (written per tile)
    sum_ref: [1, OC_pad]        f32 resident accumulator (same block every grid step)
    ssq_ref: [1, OC_pad]        f32 resident accumulator
    """
    @pl.when(pl.program_id(0) == 0)
    def _():
        sum_ref[...] = jnp.zeros_like(sum_ref)
        ssq_ref[...] = jnp.zeros_like(ssq_ref)

    y = jnp.dot(p_ref[...], w_ref[...], preferred_element_type=jnp.float32)
    y_ref[...] = y
    sum_ref[...] += jnp.sum(y, axis=0, keepdims=True)
    ssq_ref[...] += jnp.sum(y * y, axis=0, keepdims=True)


def _bn_relu_kernel(y_ref, scale_ref, shift_ref, o_ref):
    """Pass 2: fused affine BatchNorm (pre-folded scale/shift) + ReLU, in place over y."""
    o_ref[...] = jnp.maximum(y_ref[...] * scale_ref[...] + shift_ref[...],
                             jnp.float32(0.0))


def _im2col(x, k_size, pad, stride, dilation):
    """x: [N, C, H, W] -> patches [N*OH*OW, C*KH*KW], feature order (c, kh, kw)."""
    n, c, h, w = x.shape
    kh = kw = k_size
    oh = (h + 2 * pad - dilation * (kh - 1) - 1) // stride + 1
    ow = (w + 2 * pad - dilation * (kw - 1) - 1) // stride + 1
    x_pad = jnp.pad(x, ((0, 0), (0, 0), (pad, pad), (pad, pad)))
    cols = []
    for i in range(kh):
        for j in range(kw):
            h0 = i * dilation
            w0 = j * dilation
            sl = x_pad[:, :,
                       h0:h0 + (oh - 1) * stride + 1:stride,
                       w0:w0 + (ow - 1) * stride + 1:stride]   # [N, C, OH, OW]
            cols.append(sl)
    # [N, C, KH*KW, OH, OW] -> [N, OH, OW, C, KH*KW] -> [M, C*KH*KW]
    patches = jnp.stack(cols, axis=2)
    patches = patches.transpose(0, 3, 4, 1, 2).reshape(n * oh * ow, c * kh * kw)
    return patches, oh, ow


@functools.partial(jax.jit,
                   static_argnames=("k_size", "pad", "stride", "dilation", "block_m"))
def cnn_block(x, conv_w, conv_b, bn_gamma, bn_beta,
              k_size=3, pad=1, stride=1, dilation=1, block_m=512):
    """Forward of CNNBlock(in_c, out_c, k_size, activation='relu', pad, s, dilation).

    x:      [N, C_in, H, W] (NCHW, like PyTorch)
    conv_w: [OC, C_in, KH, KW];  conv_b/bn_gamma/bn_beta: [OC]
    returns [N, OC, OH, OW]
    """
    # Conv bias cancels exactly under training-mode BatchNorm (mean/var are shift-invariant).
    del conv_b

    n = x.shape[0]
    oc = conv_w.shape[0]

    patches, oh, ow = _im2col(x, k_size, pad, stride, dilation)
    m, k = patches.shape

    oc_pad = _round_up(oc, 128)                 # lane-dense output, full MXU N-dim tile
    k_pad = _round_up(k, 128)                   # lane-dense patch loads
    block_m = max(8, _round_up(block_m, 8))
    block_m = min(block_m, _round_up(m, 8))
    m_pad = _round_up(m, block_m)
    grid_m = m_pad // block_m

    # bf16 MXU operands, zero-padded to lane multiples.
    patches_p = jnp.pad(patches.astype(jnp.bfloat16), ((0, m_pad - m), (0, k_pad - k)))
    w_flat = conv_w.reshape(oc, -1).T.astype(jnp.bfloat16)                      # [K, OC]
    w_p = jnp.pad(w_flat, ((0, k_pad - k), (0, oc_pad - oc)))
    g_p = jnp.pad(bn_gamma.astype(jnp.float32).reshape(1, oc), ((0, 0), (0, oc_pad - oc)))
    b_p = jnp.pad(bn_beta.astype(jnp.float32).reshape(1, oc), ((0, 0), (0, oc_pad - oc)))

    vmem_limit = 48 * 1024 * 1024               # stay under v7x's 64 MiB physical VMEM

    # Pass 1: conv (MXU, bf16 x bf16 -> f32) + per-channel statistics.
    y_conv, ch_sum, ch_ssq = pl.pallas_call(
        _conv_stats_kernel,
        out_shape=(jax.ShapeDtypeStruct((m_pad, oc_pad), jnp.float32),
                   jax.ShapeDtypeStruct((1, oc_pad), jnp.float32),
                   jax.ShapeDtypeStruct((1, oc_pad), jnp.float32)),
        grid=(grid_m,),
        in_specs=[pl.BlockSpec((block_m, k_pad), lambda i: (i, 0)),
                  pl.BlockSpec((k_pad, oc_pad), lambda i: (0, 0))],
        out_specs=(pl.BlockSpec((block_m, oc_pad), lambda i: (i, 0)),
                   pl.BlockSpec((1, oc_pad), lambda i: (0, 0)),
                   pl.BlockSpec((1, oc_pad), lambda i: (0, 0))),
        compiler_params=pltpu.CompilerParams(
            dimension_semantics=("arbitrary",),      # resident stat accumulators across M
            vmem_limit_bytes=vmem_limit),
    )(patches_p, w_p)

    # Fold training-mode BN into a per-channel (scale, shift) once: O(OC_pad) work on
    # [1, OC_pad] arrays, hoisted out of the pass-2 grid loop. Padded channels stay 0.
    inv_count = jnp.float32(1.0 / float(m))
    mean = ch_sum * inv_count
    var = jnp.maximum(ch_ssq * inv_count - mean * mean, jnp.float32(0.0))
    scale = g_p * jax.lax.rsqrt(var + jnp.float32(1e-5))        # [1, OC_pad]
    shift = b_p - mean * scale                                  # [1, OC_pad]

    # Pass 2: per-tile fused affine + ReLU, written in place over the conv buffer
    # (independent tiles -> "parallel" for v7x megacore).
    out_flat = pl.pallas_call(
        _bn_relu_kernel,
        out_shape=jax.ShapeDtypeStruct((m_pad, oc_pad), jnp.float32),
        grid=(grid_m,),
        in_specs=[pl.BlockSpec((block_m, oc_pad), lambda i: (i, 0)),
                  pl.BlockSpec((1, oc_pad), lambda i: (0, 0)),
                  pl.BlockSpec((1, oc_pad), lambda i: (0, 0))],
        out_specs=pl.BlockSpec((block_m, oc_pad), lambda i: (i, 0)),
        input_output_aliases={0: 0},                 # reuse y_conv's HBM buffer for the output
        compiler_params=pltpu.CompilerParams(
            dimension_semantics=("parallel",),
            vmem_limit_bytes=vmem_limit),
    )(y_conv, scale, shift)

    # Slice off padding. Pipeline is NHWC internally; return NCHW to match the PyTorch module
    # (downstream Pallas consumers would prefer to keep the channel-last layout).
    return out_flat[:m, :oc].reshape(n, oh, ow, oc).transpose(0, 3, 1, 2)


def _reference(x, conv_w, conv_b, bn_gamma, bn_beta, pad, stride, dilation):
    """Pure-JAX reference mirroring kernel numerics: bf16 conv operands, f32 accumulation,
    conv bias INCLUDED (checks it cancels under BN), training-mode BN, ReLU."""
    y = jax.lax.conv_general_dilated(
        x.astype(jnp.bfloat16), conv_w.astype(jnp.bfloat16),
        window_strides=(stride, stride),
        padding=((pad, pad), (pad, pad)),
        rhs_dilation=(dilation, dilation),
        dimension_numbers=("NCHW", "OIHW", "NCHW"),
        preferred_element_type=jnp.float32)
    y = y + conv_b[None, :, None, None]
    mean = jnp.mean(y, axis=(0, 2, 3), keepdims=True)
    var = jnp.mean((y - mean) ** 2, axis=(0, 2, 3), keepdims=True)
    y = (y - mean) * jax.lax.rsqrt(var + 1e-5)
    y = bn_gamma[None, :, None, None] * y + bn_beta[None, :, None, None]
    return jnp.maximum(y, 0.0)


if __name__ == "__main__":
    # CNNBlock(in_channels=4, out_channel=8, k_size=3, activation='relu', pad=1, s=1, dilation=1)
    N, C_IN, H, W = 2, 4, 16, 16
    OC, K_SIZE, PAD, STRIDE, DIL = 8, 3, 1, 1, 1

    key = jax.random.PRNGKey(0)
    kx, kw, kb, kg, kbe = jax.random.split(key, 5)

    x = jax.random.normal(kx, (N, C_IN, H, W), dtype=jnp.float32)
    conv_w = jax.random.normal(kw, (OC, C_IN, K_SIZE, K_SIZE), dtype=jnp.float32) * 0.1
    conv_b = jax.random.normal(kb, (OC,), dtype=jnp.float32) * 0.1
    bn_gamma = 1.0 + 0.1 * jax.random.normal(kg, (OC,), dtype=jnp.float32)
    bn_beta = 0.1 * jax.random.normal(kbe, (OC,), dtype=jnp.float32)

    # block_m=128 -> 4 grid steps over M=512: exercises the tiled/pipelined path, the resident
    # statistics accumulator, and the aliased in-place pass 2 (default block_m=512 for
    # realistic sizes).
    out = cnn_block(x, conv_w, conv_b, bn_gamma, bn_beta,
                    k_size=K_SIZE, pad=PAD, stride=STRIDE, dilation=DIL, block_m=128)
    out = jax.block_until_ready(out)

    ref = _reference(x, conv_w, conv_b, bn_gamma, bn_beta, PAD, STRIDE, DIL)
    assert out.shape == (N, OC, H, W), out.shape
    max_err = float(jnp.max(jnp.abs(out - ref)))
    assert jnp.allclose(out, ref, atol=2e-3, rtol=2e-3), max_err

    print("KERNEL_OK")
</pallas_src>

<mosaic_0001>
module attributes {stable_mosaic.version = 11 : i64} {
  func.func @_conv_stats_kernel(%arg0: i32, %arg1: memref<128x128xbf16, #tpu.memory_space<vmem>>, %arg2: memref<128x128xbf16, #tpu.memory_space<vmem>>, %arg3: memref<128x128xf32, #tpu.memory_space<vmem>>, %arg4: memref<1x128xf32, #tpu.memory_space<vmem>>, %arg5: memref<1x128xf32, #tpu.memory_space<vmem>>) attributes {dimension_semantics = [#tpu.dimension_semantics<arbitrary>], iteration_bounds = array<i64: 4>, scalar_prefetch = 0 : i64, scratch_operands = 0 : i64, tpu.core_type = #tpu.core_type<tc>, window_params = [{transform_indices = @transform_0, window_bounds = array<i64: 128, 128>}, {pipeline_mode = #tpu.pipeline_mode<synchronous>, transform_indices = @transform_1, window_bounds = array<i64: 128, 128>}, {transform_indices = @transform_2, window_bounds = array<i64: 128, 128>}, {pipeline_mode = #tpu.pipeline_mode<synchronous>, transform_indices = @transform_3, window_bounds = array<i64: 1, 128>}, {pipeline_mode = #tpu.pipeline_mode<synchronous>, transform_indices = @transform_4, window_bounds = array<i64: 1, 128>}]} {
    %c0_i32 = arith.constant 0 : i32
    %0 = arith.cmpi eq, %arg0, %c0_i32 : i32
    %1 = arith.extui %0 : i1 to i32
    %c0_i32_0 = arith.constant 0 : i32
    %2 = arith.cmpi ne, %1, %c0_i32_0 : i32
    scf.if %2 {
      %cst_16 = arith.constant 0.000000e+00 : f32
      %18 = vector.broadcast %cst_16 : f32 to vector<1x128xf32>
      %c0_17 = arith.constant 0 : index
      %c0_18 = arith.constant 0 : index
      %19 = vector.load %arg4[%c0_17, %c0_18] : memref<1x128xf32, #tpu.memory_space<vmem>>, vector<1x128xf32>
      tpu.vector_store %arg4[%c0_17, %c0_18], %18 {strides = array<i32>} : memref<1x128xf32, #tpu.memory_space<vmem>>, vector<1x128xf32>,
      %cst_19 = arith.constant 0.000000e+00 : f32
      %20 = vector.broadcast %cst_19 : f32 to vector<1x128xf32>
      %c0_20 = arith.constant 0 : index
      %c0_21 = arith.constant 0 : index
      %21 = vector.load %arg5[%c0_20, %c0_21] : memref<1x128xf32, #tpu.memory_space<vmem>>, vector<1x128xf32>
      tpu.vector_store %arg5[%c0_20, %c0_21], %20 {strides = array<i32>} : memref<1x128xf32, #tpu.memory_space<vmem>>, vector<1x128xf32>,
    } else {
    }
    %c0 = arith.constant 0 : index
    %c0_1 = arith.constant 0 : index
    %3 = vector.load %arg1[%c0, %c0_1] : memref<128x128xbf16, #tpu.memory_space<vmem>>, vector<128x128xbf16>
    %c0_2 = arith.constant 0 : index
    %c0_3 = arith.constant 0 : index
    %4 = vector.load %arg2[%c0_2, %c0_3] : memref<128x128xbf16, #tpu.memory_space<vmem>>, vector<128x128xbf16>
    %cst = arith.constant dense<0.000000e+00> : vector<128x128xf32>
    %5 = tpu.matmul %3, %4, %cst {dimension_numbers = #tpu.dot_dimension_numbers<[1], [0], [0], [1], [0, 0, 1, 1], [], []>} : vector<128x128xbf16>, vector<128x128xbf16>, vector<128x128xf32> -> vector<128x128xf32>
    %c0_4 = arith.constant 0 : index
    %c0_5 = arith.constant 0 : index
    %6 = vector.load %arg3[%c0_4, %c0_5] : memref<128x128xf32, #tpu.memory_space<vmem>>, vector<128x128xf32>
    tpu.vector_store %arg3[%c0_4, %c0_5], %5 {strides = array<i32>} : memref<128x128xf32, #tpu.memory_space<vmem>>, vector<128x128xf32>,
    %c0_6 = arith.constant 0 : index
    %c0_7 = arith.constant 0 : index
    %7 = vector.load %arg4[%c0_6, %c0_7] : memref<1x128xf32, #tpu.memory_space<vmem>>, vector<1x128xf32>
    %cst_8 = arith.constant dense<0.000000e+00> : vector<128xf32>
    %8 = vector.multi_reduction <add>, %5, %cst_8 [0] : vector<128x128xf32> to vector<128xf32>
    %9 = vector.shape_cast %8 : vector<128xf32> to vector<1x128xf32>
    %10 = arith.addf %7, %9 : vector<1x128xf32>
    %c0_9 = arith.constant 0 : index
    %c0_10 = arith.constant 0 : index
    %11 = vector.load %arg4[%c0_9, %c0_10] : memref<1x128xf32, #tpu.memory_space<vmem>>, vector<1x128xf32>
    tpu.vector_store %arg4[%c0_9, %c0_10], %10 {strides = array<i32>} : memref<1x128xf32, #tpu.memory_space<vmem>>, vector<1x128xf32>,
    %c0_11 = arith.constant 0 : index
    %c0_12 = arith.constant 0 : index
    %12 = vector.load %arg5[%c0_11, %c0_12] : memref<1x128xf32, #tpu.memory_space<vmem>>, vector<1x128xf32>
    %13 = arith.mulf %5, %5 : vector<128x128xf32>
    %cst_13 = arith.constant dense<0.000000e+00> : vector<128xf32>
    %14 = vector.multi_reduction <add>, %13, %cst_13 [0] : vector<128x128xf32> to vector<128xf32>
    %15 = vector.shape_cast %14 : vector<128xf32> to vector<1x128xf32>
    %16 = arith.addf %12, %15 : vector<1x128xf32>
    %c0_14 = arith.constant 0 : index
    %c0_15 = arith.constant 0 : index
    %17 = vector.load %arg5[%c0_14, %c0_15] : memref<1x128xf32, #tpu.memory_space<vmem>>, vector<1x128xf32>
    tpu.vector_store %arg5[%c0_14, %c0_15], %16 {strides = array<i32>} : memref<1x128xf32, #tpu.memory_space<vmem>>, vector<1x128xf32>,
    return
  }
  func.func @transform_0(%arg0: i32) -> (i32, i32) {
    %c0_i32 = arith.constant 0 : i32
    %c0_i32_0 = arith.constant 0 : i32
    return %arg0, %c0_i32 : i32, i32
  }
  func.func @transform_1(%arg0: i32) -> (i32, i32) {
    %c0_i32 = arith.constant 0 : i32
    %c0_i32_0 = arith.constant 0 : i32
    %c0_i32_1 = arith.constant 0 : i32
    return %c0_i32, %c0_i32_0 : i32, i32
  }
  func.func @transform_2(%arg0: i32) -> (i32, i32) {
    %c0_i32 = arith.constant 0 : i32
    %c0_i32_0 = arith.constant 0 : i32
    return %arg0, %c0_i32 : i32, i32
  }
  func.func @transform_3(%arg0: i32) -> (i32, i32) {
    %c0_i32 = arith.constant 0 : i32
    %c0_i32_0 = arith.constant 0 : i32
    %c0_i32_1 = arith.constant 0 : i32
    return %c0_i32, %c0_i32_0 : i32, i32
  }
  func.func @transform_4(%arg0: i32) -> (i32, i32) {
    %c0_i32 = arith.constant 0 : i32
    %c0_i32_0 = arith.constant 0 : i32
    %c0_i32_1 = arith.constant 0 : i32
    return %c0_i32, %c0_i32_0 : i32, i32
  }
}

module attributes {stable_mosaic.version = 11 : i64} {
  func.func @_bn_relu_kernel(%arg0: i32, %arg1: memref<128x128xf32, #tpu.memory_space<vmem>>, %arg2: memref<1x128xf32, #tpu.memory_space<vmem>>, %arg3: memref<1x128xf32, #tpu.memory_space<vmem>>, %arg4: memref<128x128xf32, #tpu.memory_space<vmem>>) attributes {dimension_semantics = [#tpu.dimension_semantics<parallel>], iteration_bounds = array<i64: 4>, scalar_prefetch = 0 : i64, scratch_operands = 0 : i64, tpu.core_type = #tpu.core_type<tc>, window_params = [{transform_indices = @transform_0, window_bounds = array<i64: 128, 128>}, {pipeline_mode = #tpu.pipeline_mode<synchronous>, transform_indices = @transform_1, window_bounds = array<i64: 1, 128>}, {pipeline_mode = #tpu.pipeline_mode<synchronous>, transform_indices = @transform_2, window_bounds = array<i64: 1, 128>}, {transform_indices = @transform_3, window_bounds = array<i64: 128, 128>}]} {
    %c0 = arith.constant 0 : index
    %c0_0 = arith.constant 0 : index
    %0 = vector.load %arg1[%c0, %c0_0] : memref<128x128xf32, #tpu.memory_space<vmem>>, vector<128x128xf32>
    %c0_1 = arith.constant 0 : index
    %c0_2 = arith.constant 0 : index
    %1 = vector.load %arg2[%c0_1, %c0_2] : memref<1x128xf32, #tpu.memory_space<vmem>>, vector<1x128xf32>
    %2 = vector.broadcast %1 : vector<1x128xf32> to vector<128x128xf32>
    %3 = arith.mulf %0, %2 : vector<128x128xf32>
    %c0_3 = arith.constant 0 : index
    %c0_4 = arith.constant 0 : index
    %4 = vector.load %arg3[%c0_3, %c0_4] : memref<1x128xf32, #tpu.memory_space<vmem>>, vector<1x128xf32>
    %5 = vector.broadcast %4 : vector<1x128xf32> to vector<128x128xf32>
    %6 = arith.addf %3, %5 : vector<128x128xf32>
    %cst = arith.constant 0.000000e+00 : f32
    %7 = vector.broadcast %cst : f32 to vector<128x128xf32>
    %8 = arith.maximumf %6, %7 : vector<128x128xf32>
    %c0_5 = arith.constant 0 : index
    %c0_6 = arith.constant 0 : index
    %9 = vector.load %arg4[%c0_5, %c0_6] : memref<128x128xf32, #tpu.memory_space<vmem>>, vector<128x128xf32>
    tpu.vector_store %arg4[%c0_5, %c0_6], %8 {strides = array<i32>} : memref<128x128xf32, #tpu.memory_space<vmem>>, vector<128x128xf32>,
    return
  }
  func.func @transform_0(%arg0: i32) -> (i32, i32) {
    %c0_i32 = arith.constant 0 : i32
    %c0_i32_0 = arith.constant 0 : i32
    return %arg0, %c0_i32 : i32, i32
  }
  func.func @transform_1(%arg0: i32) -> (i32, i32) {
    %c0_i32 = arith.constant 0 : i32
    %c0_i32_0 = arith.constant 0 : i32
    %c0_i32_1 = arith.constant 0 : i32
    return %c0_i32, %c0_i32_0 : i32, i32
  }
  func.func @transform_2(%arg0: i32) -> (i32, i32) {
    %c0_i32 = arith.constant 0 : i32
    %c0_i32_0 = arith.constant 0 : i32
    %c0_i32_1 = arith.constant 0 : i32
    return %c0_i32, %c0_i32_0 : i32, i32
  }
  func.func @transform_3(%arg0: i32) -> (i32, i32) {
    %c0_i32 = arith.constant 0 : i32
    %c0_i32_0 = arith.constant 0 : i32
    return %arg0, %c0_i32 : i32, i32
  }
}

</mosaic_0001>

<bundles_post_ra>
// kernel: cnn_block.3
= control target key start
LH: loop header
LB: loop body
LE: loop exit
PB: predicated region body
PF: predicated region fallthrough
CT: control target
= control target key end

     0   :  { %s373_s12 = smov 0   ;;  %s439_s0 = inlined_call_operand.vmem [shape: f32[512,128], index: 0, kind: input, shape index: {}, may-alias: {0,3}]   ;;  %s440_s1 = inlined_call_operand.vmem [shape: f32[1,128], index: 1, kind: input, shape index: {}]   ;;  %s441_s2 = inlined_call_operand.vmem [shape: f32[1,128], index: 2, kind: input, shape index: {}]   ;;  %s442_s3 = inlined_call_operand.vmem [shape: f32[512,128], index: 3, kind: output, shape index: {}, may-alias: {0,3}]  }
   0x1 LB: > { %s324_s13 = sadd.s32 4294967295, %s351_s12   ;;  %p328_p0 = scmp.ge.s32.totalorder %s351_s12, 1  ;;  %s351_s12 = sphi %s373_s12, %s13_s12  }
   0x2   : > { %p138_p1 = scmp.lt.s32.totalorder %s351_s12, 5 }
   0x4   : > { %p139_p2 = pnand %p328_p0, %p138_p1 }
   0x5   : > { %s329_s14 = sshll.u32 (!%p139_p2), %s324_s13, 4  ;;  %v333_v0 = vld [vmem:[%s440_s1] ss:$0 sm:$0xff] (!%p139_p2) }
   0x6   : > { %142 = sbr.rel (%p139_p2) target bundleno = 35 (0x23), region = 32  ;;  %p163_p3 = scmp.lt.s32.totalorder (!%p139_p2), %s329_s14, 63  ;;  %v334_v1 = vld [vmem:[%s441_s2] ss:$0 sm:$0xff] (!%p139_p2) }
   0xd   : > { %s444_s14 = smov (!%p163_p3, %s329_s14), 63 }
   0xe   : > { %s330_s15 = sshll.u32 %s444_s14, 3 }
   0xf   : > { %s392_s20 = scalar_lea.vmem %s439_s0, %s330_s15  ;;  %s418_s25 = scalar_lea.vmem %s442_s3, %s330_s15 }
  0x10   : > { %v174_v2 = vld [vmem:[%s392_s20] sm:$0xff]  ;;  %v175_v3 = vld [vmem:[%s392_s20 + $0x8] sm:$0xff]  ;;  %v176_v4 = vld [vmem:[%s392_s20 + $0x10] sm:$0xff] }
  0x11   : > { %v177_v5 = vld [vmem:[%s392_s20 + $0x18] sm:$0xff]  ;;  %v178_v6 = vld [vmem:[%s392_s20 + $0x20] sm:$0xff]  ;;  %v179_v7 = vld [vmem:[%s392_s20 + $0x28] sm:$0xff]  ;;  %v197_v8 = vmul.f32 %v333_v0, %v174_v2  ;;  %v198_v9 = vmul.f32 %v333_v0, %v175_v3  ;;  %v199_v10 = vmul.f32 %v333_v0, %v176_v4 }
  0x12   : > { %v180_v11 = vld [vmem:[%s392_s20 + $0x30] sm:$0xff]  ;;  %v181_v12 = vld [vmem:[%s392_s20 + $0x38] sm:$0xff]  ;;  %v182_v13 = vld [vmem:[%s392_s20 + $0x40] sm:$0xff]  ;;  %v200_v14 = vmul.f32 %v333_v0, %v177_v5  ;;  %v201_v15 = vmul.f32 %v333_v0, %v178_v6  ;;  %v202_v16 = vmul.f32 %v333_v0, %v179_v7 }
  0x13   : > { %v183_v17 = vld [vmem:[%s392_s20 + $0x48] sm:$0xff]  ;;  %v184_v18 = vld [vmem:[%s392_s20 + $0x50] sm:$0xff]  ;;  %v185_v19 = vld [vmem:[%s392_s20 + $0x58] sm:$0xff]  ;;  %v203_v20 = vmul.f32 %v333_v0, %v180_v11  ;;  %v204_v21 = vmul.f32 %v333_v0, %v181_v12  ;;  %v205_v22 = vmul.f32 %v333_v0, %v182_v13  ;;  %v220_v23 = vadd.f32 %v334_v1, %v197_v8 }
  0x14   : > { %v186_v24 = vld [vmem:[%s392_s20 + $0x60] sm:$0xff]  ;;  %v187_v25 = vld [vmem:[%s392_s20 + $0x68] sm:$0xff]  ;;  %v188_v26 = vld [vmem:[%s392_s20 + $0x70] sm:$0xff]  ;;  %v206_v27 = vmul.f32 %v333_v0, %v183_v17  ;;  %v207_v28 = vmul.f32 %v333_v0, %v184_v18  ;;  %v208_v29 = vmul.f32 %v333_v0, %v185_v19  ;;  %v221_v30 = vadd.f32 %v334_v1, %v198_v9 }
  0x15   : > { %v189_v31 = vld [vmem:[%s392_s20 + $0x78] sm:$0xff]  ;;  %v209_v32 = vmul.f32 %v333_v0, %v186_v24  ;;  %v210_v33 = vmul.f32 %v333_v0, %v187_v25  ;;  %v211_v34 = vmul.f32 %v333_v0, %v188_v26  ;;  %v222_v35 = vadd.f32 %v334_v1, %v199_v10 }
  0x16   : > { %v212_v36 = vmul.f32 %v333_v0, %v189_v31  ;;  %v223_v37 = vadd.f32 %v334_v1, %v200_v14  ;;  %v224_v38 = vadd.f32 %v334_v1, %v201_v15  ;;  %v225_v39 = vadd.f32 %v334_v1, %v202_v16 }
  0x17   : > { %v226_v40 = vadd.f32 %v334_v1, %v203_v20  ;;  %v227_v41 = vadd.f32 %v334_v1, %v204_v21  ;;  %v228_v42 = vadd.f32 %v334_v1, %v205_v22  ;;  %v229_v43 = vadd.f32 %v334_v1, %v206_v27 }
  0x18   : > { %v230_v44 = vadd.f32 %v334_v1, %v207_v28  ;;  %v231_v45 = vadd.f32 %v334_v1, %v208_v29  ;;  %v232_v46 = vadd.f32 %v334_v1, %v209_v32  ;;  %v233_v47 = vadd.f32 %v334_v1, %v210_v33 }
  0x19   : > { %v234_v48 = vadd.f32 %v334_v1, %v211_v34  ;;  %v235_v49 = vadd.f32 %v334_v1, %v212_v36  ;;  %v236_v50 = vmax.f32 %v220_v23, 0.0  ;;  %v237_v51 = vmax.f32 %v221_v30, 0.0 }
  0x1a   : > { %v238_v52 = vmax.f32 %v222_v35, 0.0  ;;  %v239_v53 = vmax.f32 %v223_v37, 0.0  ;;  %v240_v54 = vmax.f32 %v224_v38, 0.0  ;;  %v241_v55 = vmax.f32 %v225_v39, 0.0 }
  0x1b   : > { %v242_v56 = vmax.f32 %v226_v40, 0.0  ;;  %v243_v57 = vmax.f32 %v227_v41, 0.0  ;;  %v244_v58 = vmax.f32 %v228_v42, 0.0  ;;  %v245_v59 = vmax.f32 %v229_v43, 0.0  ;;  %252 = vst [vmem:[%s418_s25] sm:$0xff] %v236_v50  ;;  %253 = vst [vmem:[%s418_s25 + $0x8] sm:$0xff] %v237_v51 }
  0x1c   : > { %v246_v60 = vmax.f32 %v230_v44, 0.0  ;;  %v247_v61 = vmax.f32 %v231_v45, 0.0  ;;  %v248_v62 = vmax.f32 %v232_v46, 0.0  ;;  %v249_v63 = vmax.f32 %v233_v47, 0.0  ;;  %254 = vst [vmem:[%s418_s25 + $0x10] sm:$0xff] %v238_v52  ;;  %255 = vst [vmem:[%s418_s25 + $0x18] sm:$0xff] %v239_v53 }
  0x1d   : > { %256 = vst [vmem:[%s418_s25 + $0x20] sm:$0xff] %v240_v54  ;;  %257 = vst [vmem:[%s418_s25 + $0x28] sm:$0xff] %v241_v55  ;;  %v250_v0 = vmax.f32 %v234_v48, 0.0  ;;  %v251_v1 = vmax.f32 %v235_v49, 0.0 }
  0x1e   : > { %258 = vst [vmem:[%s418_s25 + $0x30] sm:$0xff] %v242_v56  ;;  %259 = vst [vmem:[%s418_s25 + $0x38] sm:$0xff] %v243_v57 }
  0x1f   : > { %260 = vst [vmem:[%s418_s25 + $0x40] sm:$0xff] %v244_v58  ;;  %261 = vst [vmem:[%s418_s25 + $0x48] sm:$0xff] %v245_v59 }
  0x20   : > { %262 = vst [vmem:[%s418_s25 + $0x50] sm:$0xff] %v246_v60  ;;  %263 = vst [vmem:[%s418_s25 + $0x58] sm:$0xff] %v247_v61 }
  0x21   : > { %264 = vst [vmem:[%s418_s25 + $0x60] sm:$0xff] %v248_v62  ;;  %265 = vst [vmem:[%s418_s25 + $0x68] sm:$0xff] %v249_v63 }
  0x22   : > { %266 = vst [vmem:[%s418_s25 + $0x70] sm:$0xff] %v250_v0  ;;  %267 = vst [vmem:[%s418_s25 + $0x78] sm:$0xff] %v251_v1 }
  0x23 PF: > { %s13_s12 = sadd.s32 1, %s351_s12  }
  0x24   : > { %p10_p4 = scmp.ge.s32.totalorder %s13_s12, 6  }
  0x26   :  { %12 = sbr.rel (!%p10_p4) target bundleno = 1 (0x1), region = 62 }

// kernel: cnn_block.2
= control target key start
LH: loop header
LB: loop body
LE: loop exit
PB: predicated region body
PF: predicated region fallthrough
CT: control target
= control target key end

     0   :  { %s727_s15 = smov 0   ;;  %s814_s0 = inlined_call_operand.vmem [shape: bf16[512,128], index: 0, kind: input, shape index: {}]   ;;  %s815_s1 = inlined_call_operand.vmem [shape: bf16[128,128], index: 1, kind: input, shape index: {}]   ;;  %s816_s2 = inlined_call_operand.vmem [shape: f32[512,128], index: 2, kind: output, shape index: {0}]   ;;  %s817_s3 = inlined_call_operand.vmem [shape: f32[1,128], index: 3, kind: output, shape index: {1}]   ;;  %s818_s4 = inlined_call_operand.vmem [shape: f32[1,128], index: 4, kind: output, shape index: {2}]  }
   0x1 LB: > { %s576_s16 = sadd.s32 4294967295, %s699_s15   ;;  %p580_p0 = scmp.ge.s32.totalorder %s699_s15, 1  ;;  %s699_s15 = sphi %s727_s15, %s15_s15  }
   0x2   : > { %p158_p1 = scmp.lt.s32.totalorder %s699_s15, 5 }
   0x4   : > { %p159_p2 = pnand %p580_p0, %p158_p1 }
   0x5   : > { %s581_s17 = sshll.u32 (!%p159_p2), %s576_s16, 4  ;;  %p585_p4 = scmp.ne.s32.totalorder (!%p159_p2), %s576_s16, 0 }
   0x6   : > { %162 = sbr.rel (%p159_p2) target bundleno = 315 (0x13b), region = 28  ;;  %p185_p3 = scmp.lt.s32.totalorder (!%p159_p2), %s581_s17, 63 }
   0xd   : > { %s820_s17 = smov (!%p185_p3, %s581_s17), 63  ;;  %200 = sbr.rel (%p585_p4) target bundleno = 20 (0x14), region = 32 }
   0xe   : > { %s582_s18 = sshll.u32 %s820_s17, 2  ;;  %s584_s19 = sshll.u32 %s820_s17, 3  ;;  %v701_v0 = vmov (!%p585_p4), 0.0  }
   0xf   : > { %s738_s22 = scalar_lea.vmem %s814_s0, %s582_s18  ;;  %s743_s25 = scalar_lea.vmem %s816_s2, %s584_s19  ;;  %201 = vst [vmem:[%s817_s3] sm:$0x1] (!%p585_p4), %v701_v0  ;;  %202 = vst [vmem:[%s818_s4] sm:$0x1] (!%p585_p4), %v701_v0 }
  0x14 PF: > { %v677_v1 = vld [vmem:[%s815_s1] sm:$0xff]   ;;  %v678_v2 = vld [vmem:[%s815_s1 + $0x8] sm:$0xff]   ;;  %v679_v3 = vld [vmem:[%s815_s1 + $0x10] sm:$0xff]  }
  0x15   : > { %620 = vmatprep.subr.bf16.mxu0 %v677_v1  ;;  %652 = vmatprep.subr.bf16.mxu1 %v677_v1  ;;  %v680_v4 = vld [vmem:[%s815_s1 + $0x18] sm:$0xff]   ;;  %v685_v5 = vld [vmem:[%s738_s22] sm:$0xff]   ;;  %v682_v8 = vld [vmem:[%s815_s1 + $0x28] sm:$0xff]  }
  0x16   : > { %621 = vmatpush3.bf16.msra.mxu0 %v677_v1  ;;  %660 = vmatpush3.bf16.msra.mxu1 %v677_v1  ;;  %v681_v6 = vld [vmem:[%s815_s1 + $0x20] sm:$0xff]   ;;  %v683_v9 = vld [vmem:[%s815_s1 + $0x30] sm:$0xff]   ;;  %v684_v10 = vld [vmem:[%s815_s1 + $0x38] sm:$0xff]  }
  0x17   : > { %622 = vmatprep.subr.bf16.mxu0 %v678_v2  ;;  %653 = vmatprep.subr.bf16.mxu1 %v678_v2  ;;  %v689_v7 = vld [vmem:[%s738_s22 + $0x20] sm:$0xff]   ;;  %v686_v11 = vld [vmem:[%s738_s22 + $0x8] sm:$0xff]   ;;  %v687_v13 = vld [vmem:[%s738_s22 + $0x10] sm:$0xff]  }
  0x18   : > { %636 = vmatprep.mubr.bf16.mxu0 %v685_v5  ;;  %644 = vmatprep.mubr.bf16.mxu1 %v689_v7  ;;  %v690_v12 = vld [vmem:[%s738_s22 + $0x28] sm:$0xff]   ;;  %v691_v14 = vld [vmem:[%s738_s22 + $0x30] sm:$0xff]   ;;  %v688_v15 = vld [vmem:[%s738_s22 + $0x18] sm:$0xff]  }
  0x19   : > { %v692_v16 = vld [vmem:[%s738_s22 + $0x38] sm:$0xff]  }
  0x1a   : > { %623 = vmatpush3.bf16.msra.mxu0 %v678_v2  ;;  %661 = vmatpush3.bf16.msra.mxu1 %v678_v2 }
  0x1b   : > { %624 = vmatprep.subr.bf16.mxu0 %v679_v3  ;;  %654 = vmatprep.subr.bf16.mxu1 %v679_v3 }
  0x1e   : > { %625 = vmatpush3.bf16.msra.mxu0 %v679_v3  ;;  %662 = vmatpush3.bf16.msra.mxu1 %v679_v3 }
  0x1f   : > { %626 = vmatprep.subr.bf16.mxu0 %v680_v4  ;;  %655 = vmatprep.subr.bf16.mxu1 %v680_v4 }
  0x22   : > { %627 = vmatpush3.bf16.msra.mxu0 %v680_v4  ;;  %663 = vmatpush3.bf16.msra.mxu1 %v680_v4 }
  0x23   : > { %628 = vmatprep.subr.bf16.mxu0 %v681_v6  ;;  %656 = vmatprep.subr.bf16.mxu1 %v681_v6 }
  0x26   : > { %629 = vmatpush3.bf16.msra.mxu0 %v681_v6  ;;  %664 = vmatpush3.bf16.msra.mxu1 %v681_v6 }
  0x27   : > { %630 = vmatprep.subr.bf16.mxu0 %v682_v8  ;;  %657 = vmatprep.subr.bf16.mxu1 %v682_v8 }
  0x2a   : > { %631 = vmatpush3.bf16.msra.mxu0 %v682_v8  ;;  %665 = vmatpush3.bf16.msra.mxu1 %v682_v8 }
  0x2b   : > { %632 = vmatprep.subr.bf16.mxu0 %v683_v9  ;;  %658 = vmatprep.subr.bf16.mxu1 %v683_v9 }
  0x2e   : > { %633 = vmatpush3.bf16.msra.mxu0 %v683_v9  ;;  %666 = vmatpush3.bf16.msra.mxu1 %v683_v9 }
  0x2f   : > { %634 = vmatprep.subr.bf16.mxu0 %v684_v10  ;;  %659 = vmatprep.subr.bf16.mxu1 %v684_v10 }
  0x32   : > { %635 = vmatpush3.bf16.msra.mxu0 %v684_v10  ;;  %667 = vmatpush3.bf16.msra.mxu1 %v684_v10 }
  0x35   : > { %637 = vmatmul.mubr.bf16.vlgmr.msra.gmra.mrb[0].mxu0 %v686_v11  ;;  %645 = vmatmul.mubr.bf16.vlgmr.msra.gmra.mrb[0].mxu1 %v690_v12 }
  0x36   : > { %640 = vmatprep.mubr.bf16.mxu0 %v687_v13  ;;  %648 = vmatprep.mubr.bf16.mxu1 %v691_v14 }
  0x3d   : > { %641 = vmatmul.mubr.bf16.gmra.mrb[4].mxu0 %v688_v15  ;;  %649 = vmatmul.mubr.bf16.gmra.mrb[4].mxu1 %v692_v16 }
 0x108   : > { %v638_v17 = vpop.f32.mrb[0].mxu0  ;;  %v646_v18 = vpop.f32.mrb[0].mxu1 }
 0x109   : > { %430 = vst [vmem:[%s743_s25 + $0x10] sm:$0xff] %v638_v17  ;;  %v365_v19 = vpop.f32.mrb[1].mxu0  ;;  %438 = vst [vmem:[%s743_s25 + $0x50] sm:$0xff] %v646_v18  ;;  %v397_v20 = vpop.f32.mrb[1].mxu1  ;;  %v471_v28 = vmul.f32 %v638_v17, %v638_v17  ;;  %v479_v60 = vmul.f32 %v646_v18, %v646_v18 }
 0x10a   : > { %428 = vst [vmem:[%s743_s25] sm:$0xff] %v365_v19  ;;  %v639_v21 = vpop.f32.mrb[2].mxu0  ;;  %436 = vst [vmem:[%s743_s25 + $0x40] sm:$0xff] %v397_v20  ;;  %v647_v22 = vpop.f32.mrb[2].mxu1  ;;  %v469_v25 = vmul.f32 %v365_v19, %v365_v19  ;;  %v477_v54 = vmul.f32 %v397_v20, %v397_v20 }
 0x10b   : > { %431 = vst [vmem:[%s743_s25 + $0x18] sm:$0xff] %v639_v21  ;;  %v368_v23 = vpop.f32.mrb[3].mxu0  ;;  %439 = vst [vmem:[%s743_s25 + $0x58] sm:$0xff] %v647_v22  ;;  %v400_v24 = vpop.f32.mrb[3].mxu1  ;;  %v472_v31 = vmul.f32 %v639_v21, %v639_v21  ;;  %v480_v63 = vmul.f32 %v647_v22, %v647_v22 }
 0x10c   : > { %429 = vst [vmem:[%s743_s25 + $0x8] sm:$0xff] %v368_v23  ;;  %v445_v26 = vadd.f32 %v368_v23, %v365_v19  ;;  %v470_v27 = vmul.f32 %v368_v23, %v368_v23  ;;  %437 = vst [vmem:[%s743_s25 + $0x48] sm:$0xff] %v400_v24  ;;  %v478_v59 = vmul.f32 %v400_v24, %v400_v24 }
 0x10e   : > { %v446_v29 = vadd.f32 %v638_v17, %v445_v26  ;;  %v485_v30 = vadd.f32 %v470_v27, %v469_v25  ;;  %v468_v27 = vld [vmem:[%s818_s4] sm:$0x1] }
 0x110   : > { %v486_v32 = vadd.f32 %v485_v30, %v471_v28  ;;  %v642_v33 = vpop.f32.mrb[4].mxu0  ;;  %v447_v34 = vadd.f32 %v639_v21, %v446_v29  ;;  %v650_v35 = vpop.f32.mrb[4].mxu1 }
 0x111   : > { %434 = vst [vmem:[%s743_s25 + $0x30] sm:$0xff] %v642_v33  ;;  %v381_v36 = vpop.f32.mrb[5].mxu0  ;;  %442 = vst [vmem:[%s743_s25 + $0x70] sm:$0xff] %v650_v35  ;;  %v413_v37 = vpop.f32.mrb[5].mxu1  ;;  %v475_v48 = vmul.f32 %v642_v33, %v642_v33  ;;  %v483_v8 = vmul.f32 %v650_v35, %v650_v35 }
 0x112   : > { %432 = vst [vmem:[%s743_s25 + $0x20] sm:$0xff] %v381_v36  ;;  %v448_v38 = vadd.f32 %v447_v34, %v381_v36  ;;  %v473_v39 = vmul.f32 %v381_v36, %v381_v36  ;;  %v487_v40 = vadd.f32 %v486_v32, %v472_v31  ;;  %v643_v41 = vpop.f32.mrb[6].mxu0  ;;  %440 = vst [vmem:[%s743_s25 + $0x60] sm:$0xff] %v413_v37  ;;  %v651_v42 = vpop.f32.mrb[6].mxu1 }
 0x113   : > { %435 = vst [vmem:[%s743_s25 + $0x38] sm:$0xff] %v643_v41  ;;  %v384_v43 = vpop.f32.mrb[7].mxu0  ;;  %443 = vst [vmem:[%s743_s25 + $0x78] sm:$0xff] %v651_v42  ;;  %v416_v44 = vpop.f32.mrb[7].mxu1  ;;  %v476_v51 = vmul.f32 %v643_v41, %v643_v41  ;;  %v481_v2 = vmul.f32 %v413_v37, %v413_v37  ;;  %v484_v11 = vmul.f32 %v651_v42, %v651_v42 }
 0x114   : > { %v488_v45 = vadd.f32 %v487_v40, %v473_v39  ;;  %433 = vst [vmem:[%s743_s25 + $0x28] sm:$0xff] %v384_v43  ;;  %v449_v46 = vadd.f32 %v448_v38, %v384_v43  ;;  %v474_v47 = vmul.f32 %v384_v43, %v384_v43  ;;  %441 = vst [vmem:[%s743_s25 + $0x68] sm:$0xff] %v416_v44 }
 0x115   : > { %v482_v7 = vmul.f32 %v416_v44, %v416_v44 }
 0x116   : > { %v450_v49 = vadd.f32 %v642_v33, %v449_v46  ;;  %v489_v50 = vadd.f32 %v488_v45, %v474_v47 }
 0x118   : > { %v490_v52 = vadd.f32 %v489_v50, %v475_v48  ;;  %v451_v53 = vadd.f32 %v643_v41, %v450_v49 }
 0x11a   : > { %v452_v55 = vadd.f32 %v451_v53, %v397_v20  ;;  %v491_v56 = vadd.f32 %v490_v52, %v476_v51 }
 0x11c   : > { %v492_v57 = vadd.f32 %v491_v56, %v477_v54  ;;  %v453_v58 = vadd.f32 %v452_v55, %v400_v24  ;;  %v444_v24 = vld [vmem:[%s817_s3] sm:$0x1] }
 0x11e   : > { %v454_v61 = vadd.f32 %v646_v18, %v453_v58  ;;  %v493_v62 = vadd.f32 %v492_v57, %v478_v59 }
 0x120   : > { %v494_v0 = vadd.f32 %v493_v62, %v479_v60  ;;  %v455_v1 = vadd.f32 %v647_v22, %v454_v61 }
 0x122   : > { %v456_v3 = vadd.f32 %v455_v1, %v413_v37  ;;  %v495_v4 = vadd.f32 %v494_v0, %v480_v63 }
 0x124   : > { %v496_v5 = vadd.f32 %v495_v4, %v481_v2  ;;  %v457_v6 = vadd.f32 %v456_v3, %v416_v44 }
 0x126   : > { %v458_v9 = vadd.f32 %v650_v35, %v457_v6  ;;  %v497_v10 = vadd.f32 %v496_v5, %v482_v7 }
 0x128   : > { %v459_v12 = vadd.f32 %v651_v42, %v458_v9  ;;  %v498_v13 = vadd.f32 %v497_v10, %v483_v8 }
 0x12a   : > { %v460_v14 = vrot.slane %v459_v12, 4  ;;  %v499_v15 = vadd.f32 %v498_v13, %v484_v11 }
 0x12c   : > { %v461_v16 = vadd.f32 %v460_v14, %v459_v12  ;;  %v500_v17 = vrot.slane %v499_v15, 4 }
 0x12e   : > { %v462_v18 = vrot.slane %v461_v16, 2  ;;  %v501_v19 = vadd.f32 %v500_v17, %v499_v15 }
 0x130   : > { %v463_v20 = vadd.f32 %v462_v18, %v461_v16  ;;  %v502_v21 = vrot.slane %v501_v19, 2 }
 0x132   : > { %v464_v22 = vrot.slane %v463_v20, 1  ;;  %v503_v23 = vadd.f32 %v502_v21, %v501_v19 }
 0x134   : > { %v465_v25 = vadd.f32 %v464_v22, %v463_v20  ;;  %v504_v26 = vrot.slane %v503_v23, 1 }
 0x136   : > { %v466_v28 = vadd.f32 %v465_v25, %v444_v24  ;;  %v505_v29 = vadd.f32 %v504_v26, %v503_v23 }
 0x138   : > { %467 = vst [vmem:[%s817_s3] sm:$0x1] %v466_v28  ;;  %v506_v30 = vadd.f32 %v505_v29, %v468_v27 }
 0x13a   : > { %507 = vst [vmem:[%s818_s4] sm:$0x1] %v506_v30 }
 0x13b PF: > { %s15_s15 = sadd.s32 1, %s699_s15  }
 0x13c   : > { %p12_p5 = scmp.ge.s32.totalorder %s15_s15, 6  }
 0x13e   :  { %14 = sbr.rel (!%p12_p5) target bundleno = 1 (0x1), region = 78 }

</bundles_post_ra>
